<compile_context>
chip_gen: v5e
topology: v5e:2x2
jax: 0.10.0
libtpu: 0.0.40
codegen_flags: <defaults>
</compile_context>

<pallas_src>
import math
import string

import jax
import jax.numpy as jnp
from jax import lax
from jax.experimental import pallas as pl
from jax.experimental.pallas import tpu as pltpu


ALL_LETTERS = string.ascii_letters + " .,;'"
N_LETTERS = len(ALL_LETTERS)

NEG_INF = -1e30          # bias for padded logit lanes -> exp() == 0 in softmax


# ---------------------------------------------------------------------------
# Kernel: full-sequence RNN recurrence in a single invocation (grid = ()).
#   h_t    = onehot(x_t) @ Wx_h + h_{t-1} @ Wh_h + b_h          (every step)
#   output = log_softmax(onehot(x_{T-1}) @ Wx_o + h_{T-2} @ Wh_o + b_o)
# The onehot@Wx terms (+ bias) arrive pre-gathered as rows (xh_ref / xo_ref).
# ---------------------------------------------------------------------------
def make_rnn_seq_kernel(T):
    def kernel(xh_ref,    # (T, H)     W_i2h[x_t] + b_i2h   (bias folded in)
               xo_ref,    # (1, Opad)  W_i2o[x_{T-1}] + b_i2o, lane-padded
               whh_ref,   # (H, H)     hidden block of W_i2h
               who_ref,   # (H, Opad)  hidden block of W_i2o, zero-padded lanes
               h0_ref,    # (1, H)     initial hidden state
               out_ref,   # (1, Opad)  final log-probs (lane-dense)
               hid_ref):  # (1, H)     final hidden state
        whh = whh_ref[...]                                   # resident (H, H)

        # Recurrence for steps 0 .. T-2, hidden carried in vregs.  Unrolled so
        # the LLO scheduler can overlap the next step's row load / add with
        # the previous step's MXU drain.
        def step(t, h):
            return (jnp.dot(h, whh, preferred_element_type=jnp.float32)
                    + xh_ref[pl.ds(t, 1), :])

        h_prev = lax.fori_loop(0, T - 1, step, h0_ref[...], unroll=True)

        # Final step: the module applies i2h and i2o to the SAME `combined`
        # (i.e. the same pre-update hidden h_prev).
        hid_ref[...] = (jnp.dot(h_prev, whh,
                                preferred_element_type=jnp.float32)
                        + xh_ref[pl.ds(T - 1, 1), :])

        logits = (jnp.dot(h_prev, who_ref[...],
                          preferred_element_type=jnp.float32)
                  + xo_ref[...])                             # (1, Opad)

        # Numerically stable log-softmax; padded lanes carry -1e30 bias so
        # they contribute exp()==0 and are sliced away in the wrapper.
        m = jnp.max(logits, axis=1, keepdims=True)
        s = logits - m
        lse = jnp.log(jnp.sum(jnp.exp(s), axis=1, keepdims=True))
        out_ref[...] = (s - lse).astype(out_ref.dtype)

    return kernel


def rnn_forward_sequence(letter_idx, h0, raw_params):
    """Run the RNN over a whole sequence in ONE pallas_call.

    letter_idx: (T,) int32 letter indices (replaces the one-hot tensor)
    h0:         (1, H) initial hidden state
    raw_params: (w_i2h (I+H, H), b_i2h (1, H), w_i2o (I+H, O), b_i2o (1, O))
                stored as torch weight.T (in_features, out_features)
    Returns (final_log_probs (1, O), final_hidden (1, H)).
    """
    w_i2h, b_i2h, w_i2o, b_i2o = raw_params
    T = int(letter_idx.shape[0])
    B, H = h0.shape
    I = w_i2h.shape[0] - H
    O = w_i2o.shape[1]
    assert B == 1, "module semantics: single-sequence recurrence (batch=1)"

    O_pad = max(128, int(pl.cdiv(O, 128)) * 128)             # lane-dense head

    # Split (I+H, .) weights into input-row and hidden-row blocks.
    wx_h, wh_h = w_i2h[:I], w_i2h[I:]                        # (I,H), (H,H)
    wx_o, wh_o = w_i2o[:I], w_i2o[I:]                        # (I,O), (H,O)

    # torch's letterToIndex returns -1 for unknown chars and `tensor[-1]=1`
    # hits the last letter slot; `% N_LETTERS` reproduces that and guarantees
    # in-bounds gathers.
    idx = letter_idx % N_LETTERS

    # one-hot(x) @ W  ==  row gather; fold the biases in (one-time XLA ops).
    xh_rows = wx_h[idx] + b_i2h                              # (T, H)
    xo_last = wx_o[idx[-1:]] + b_i2o                         # (1, O)

    # Lane-pad the classifier head so the final store is an unmasked vst.
    wh_o_p = jnp.pad(wh_o, ((0, 0), (0, O_pad - O)))
    xo_p = jnp.pad(xo_last, ((0, 0), (0, O_pad - O)), constant_values=NEG_INF)

    vmem = pl.BlockSpec(memory_space=pltpu.MemorySpace.VMEM)
    out, hid = pl.pallas_call(
        make_rnn_seq_kernel(T),
        out_shape=(jax.ShapeDtypeStruct((B, O_pad), jnp.float32),
                   jax.ShapeDtypeStruct((B, H), jnp.float32)),
        in_specs=[vmem, vmem, vmem, vmem, vmem],
        out_specs=(vmem, vmem),
    )(xh_rows, xo_p, wh_h, wh_o_p, h0)

    return out[:, :O], hid


# ---------------------------------------------------------------------------
# Parameter construction (deterministic, PyTorch nn.Linear-style uniform init)
# ---------------------------------------------------------------------------
def init_params(key, input_size, hidden_size, output_size):
    combined = input_size + hidden_size
    bound = 1.0 / math.sqrt(combined)
    k = jax.random.split(key, 4)
    # weights stored as (in_features, out_features) == torch weight.T
    w_i2h = jax.random.uniform(k[0], (combined, hidden_size), jnp.float32,
                               minval=-bound, maxval=bound)
    b_i2h = jax.random.uniform(k[1], (1, hidden_size), jnp.float32,
                               minval=-bound, maxval=bound)
    w_i2o = jax.random.uniform(k[2], (combined, output_size), jnp.float32,
                               minval=-bound, maxval=bound)
    b_i2o = jax.random.uniform(k[3], (1, output_size), jnp.float32,
                               minval=-bound, maxval=bound)
    return (w_i2h, b_i2h, w_i2o, b_i2o)


def line_to_indices(line):
    """lineToTensor analog: letter indices instead of a (T,1,57) one-hot."""
    return jnp.asarray([ALL_LETTERS.find(c) for c in line], jnp.int32)


if __name__ == "__main__":
    input_size = N_LETTERS          # 57 (one-hot letters)
    hidden_size = 128               # n_hidden in the original spec
    output_size = 18                # small classifier head
    batch = 1                       # module uses hidden = zeros(1, n_hidden)

    key = jax.random.PRNGKey(0)
    raw = init_params(key, input_size, hidden_size, output_size)

    idxs = line_to_indices("Albert")                     # (6,)
    h0 = jnp.zeros((batch, hidden_size), jnp.float32)

    log_probs, hidden = rnn_forward_sequence(idxs, h0, raw)
    log_probs, hidden = jax.block_until_ready((log_probs, hidden))

    # Pure-JAX reference: the original per-step module semantics.
    def ref_forward(idxs, h0, raw):
        w_i2h, b_i2h, w_i2o, b_i2o = raw
        h = h0
        out = None
        for t in range(idxs.shape[0]):
            x = jax.nn.one_hot(idxs[t] % N_LETTERS, N_LETTERS,
                               dtype=jnp.float32)[None, :]
            c = jnp.concatenate([x, h], axis=1)          # torch.cat((input, hidden), 1)
            new_h = c @ w_i2h + b_i2h                    # self.i2h(combined)
            out = jax.nn.log_softmax(c @ w_i2o + b_i2o, axis=1)  # i2o + LogSoftmax
            h = new_h
        return out, h

    out_ref, h_ref = ref_forward(idxs, h0, raw)

    assert jnp.allclose(log_probs, out_ref, atol=1e-4, rtol=1e-4), "output mismatch"
    assert jnp.allclose(hidden, h_ref, atol=1e-4, rtol=1e-4), "hidden mismatch"
    print("KERNEL_OK")
</pallas_src>

<mosaic_0001>
module attributes {stable_mosaic.version = 11 : i64} {
  func.func @kernel(%arg0: memref<6x128xf32, #tpu.memory_space<vmem>>, %arg1: memref<1x128xf32, #tpu.memory_space<vmem>>, %arg2: memref<128x128xf32, #tpu.memory_space<vmem>>, %arg3: memref<128x128xf32, #tpu.memory_space<vmem>>, %arg4: memref<1x128xf32, #tpu.memory_space<vmem>>, %arg5: memref<1x128xf32, #tpu.memory_space<vmem>>, %arg6: memref<1x128xf32, #tpu.memory_space<vmem>>) attributes {dimension_semantics = [], scalar_prefetch = 0 : i64, scratch_operands = 0 : i64, tpu.core_type = #tpu.core_type<tc>} {
    %c0 = arith.constant 0 : index
    %c0_0 = arith.constant 0 : index
    %0 = vector.load %arg2[%c0, %c0_0] : memref<128x128xf32, #tpu.memory_space<vmem>>, vector<128x128xf32>
    %c0_1 = arith.constant 0 : index
    %c0_2 = arith.constant 0 : index
    %1 = vector.load %arg4[%c0_1, %c0_2] : memref<1x128xf32, #tpu.memory_space<vmem>>, vector<1x128xf32>
    %c0_i32 = arith.constant 0 : i32
    %cst = arith.constant dense<0.000000e+00> : vector<1x128xf32>
    %2 = tpu.matmul %1, %0, %cst {dimension_numbers = #tpu.dot_dimension_numbers<[1], [0], [0], [1], [0, 0, 1, 1], [], []>} : vector<1x128xf32>, vector<128x128xf32>, vector<1x128xf32> -> vector<1x128xf32>
    %3 = arith.index_cast %c0_i32 : i32 to index
    %c0_3 = arith.constant 0 : index
    %4 = vector.load %arg0[%3, %c0_3] : memref<6x128xf32, #tpu.memory_space<vmem>>, vector<1x128xf32>
    %5 = arith.addf %2, %4 : vector<1x128xf32>
    %c1_i32 = arith.constant 1 : i32
    %cst_4 = arith.constant dense<0.000000e+00> : vector<1x128xf32>
    %6 = tpu.matmul %5, %0, %cst_4 {dimension_numbers = #tpu.dot_dimension_numbers<[1], [0], [0], [1], [0, 0, 1, 1], [], []>} : vector<1x128xf32>, vector<128x128xf32>, vector<1x128xf32> -> vector<1x128xf32>
    %7 = arith.index_cast %c1_i32 : i32 to index
    %c0_5 = arith.constant 0 : index
    %8 = vector.load %arg0[%7, %c0_5] : memref<6x128xf32, #tpu.memory_space<vmem>>, vector<1x128xf32>
    %9 = arith.addf %6, %8 : vector<1x128xf32>
    %c2_i32 = arith.constant 2 : i32
    %cst_6 = arith.constant dense<0.000000e+00> : vector<1x128xf32>
    %10 = tpu.matmul %9, %0, %cst_6 {dimension_numbers = #tpu.dot_dimension_numbers<[1], [0], [0], [1], [0, 0, 1, 1], [], []>} : vector<1x128xf32>, vector<128x128xf32>, vector<1x128xf32> -> vector<1x128xf32>
    %11 = arith.index_cast %c2_i32 : i32 to index
    %c0_7 = arith.constant 0 : index
    %12 = vector.load %arg0[%11, %c0_7] : memref<6x128xf32, #tpu.memory_space<vmem>>, vector<1x128xf32>
    %13 = arith.addf %10, %12 : vector<1x128xf32>
    %c3_i32 = arith.constant 3 : i32
    %cst_8 = arith.constant dense<0.000000e+00> : vector<1x128xf32>
    %14 = tpu.matmul %13, %0, %cst_8 {dimension_numbers = #tpu.dot_dimension_numbers<[1], [0], [0], [1], [0, 0, 1, 1], [], []>} : vector<1x128xf32>, vector<128x128xf32>, vector<1x128xf32> -> vector<1x128xf32>
    %15 = arith.index_cast %c3_i32 : i32 to index
    %c0_9 = arith.constant 0 : index
    %16 = vector.load %arg0[%15, %c0_9] : memref<6x128xf32, #tpu.memory_space<vmem>>, vector<1x128xf32>
    %17 = arith.addf %14, %16 : vector<1x128xf32>
    %c4_i32 = arith.constant 4 : i32
    %cst_10 = arith.constant dense<0.000000e+00> : vector<1x128xf32>
    %18 = tpu.matmul %17, %0, %cst_10 {dimension_numbers = #tpu.dot_dimension_numbers<[1], [0], [0], [1], [0, 0, 1, 1], [], []>} : vector<1x128xf32>, vector<128x128xf32>, vector<1x128xf32> -> vector<1x128xf32>
    %19 = arith.index_cast %c4_i32 : i32 to index
    %c0_11 = arith.constant 0 : index
    %20 = vector.load %arg0[%19, %c0_11] : memref<6x128xf32, #tpu.memory_space<vmem>>, vector<1x128xf32>
    %21 = arith.addf %18, %20 : vector<1x128xf32>
    %c5_i32 = arith.constant 5 : i32
    %cst_12 = arith.constant dense<0.000000e+00> : vector<1x128xf32>
    %22 = tpu.matmul %21, %0, %cst_12 {dimension_numbers = #tpu.dot_dimension_numbers<[1], [0], [0], [1], [0, 0, 1, 1], [], []>} : vector<1x128xf32>, vector<128x128xf32>, vector<1x128xf32> -> vector<1x128xf32>
    %c5 = arith.constant 5 : index
    %c0_13 = arith.constant 0 : index
    %23 = vector.load %arg0[%c5, %c0_13] : memref<6x128xf32, #tpu.memory_space<vmem>>, vector<1x128xf32>
    %24 = arith.addf %22, %23 : vector<1x128xf32>
    %c0_14 = arith.constant 0 : index
    %c0_15 = arith.constant 0 : index
    %25 = vector.load %arg6[%c0_14, %c0_15] : memref<1x128xf32, #tpu.memory_space<vmem>>, vector<1x128xf32>
    tpu.vector_store %arg6[%c0_14, %c0_15], %24 {strides = array<i32>} : memref<1x128xf32, #tpu.memory_space<vmem>>, vector<1x128xf32>,
    %c0_16 = arith.constant 0 : index
    %c0_17 = arith.constant 0 : index
    %26 = vector.load %arg3[%c0_16, %c0_17] : memref<128x128xf32, #tpu.memory_space<vmem>>, vector<128x128xf32>
    %cst_18 = arith.constant dense<0.000000e+00> : vector<1x128xf32>
    %27 = tpu.matmul %21, %26, %cst_18 {dimension_numbers = #tpu.dot_dimension_numbers<[1], [0], [0], [1], [0, 0, 1, 1], [], []>} : vector<1x128xf32>, vector<128x128xf32>, vector<1x128xf32> -> vector<1x128xf32>
    %c0_19 = arith.constant 0 : index
    %c0_20 = arith.constant 0 : index
    %28 = vector.load %arg1[%c0_19, %c0_20] : memref<1x128xf32, #tpu.memory_space<vmem>>, vector<1x128xf32>
    %29 = arith.addf %27, %28 : vector<1x128xf32>
    %cst_21 = arith.constant dense<0xFF800000> : vector<1xf32>
    %30 = vector.multi_reduction <maximumf>, %29, %cst_21 [1] : vector<1x128xf32> to vector<1xf32>
    %31 = vector.shape_cast %30 : vector<1xf32> to vector<1x1xf32>
    %32 = vector.broadcast %31 : vector<1x1xf32> to vector<1x128xf32>
    %33 = arith.subf %29, %32 : vector<1x128xf32>
    %34 = math.exp %33 : vector<1x128xf32>
    %cst_22 = arith.constant dense<0.000000e+00> : vector<1xf32>
    %35 = vector.multi_reduction <add>, %34, %cst_22 [1] : vector<1x128xf32> to vector<1xf32>
    %36 = vector.shape_cast %35 : vector<1xf32> to vector<1x1xf32>
    %37 = math.log %36 : vector<1x1xf32>
    %38 = vector.broadcast %37 : vector<1x1xf32> to vector<1x128xf32>
    %39 = arith.subf %33, %38 : vector<1x128xf32>
    %c0_23 = arith.constant 0 : index
    %c0_24 = arith.constant 0 : index
    %40 = vector.load %arg5[%c0_23, %c0_24] : memref<1x128xf32, #tpu.memory_space<vmem>>, vector<1x128xf32>
    tpu.vector_store %arg5[%c0_23, %c0_24], %39 {strides = array<i32>} : memref<1x128xf32, #tpu.memory_space<vmem>>, vector<1x128xf32>,
    return
  }
}

</mosaic_0001>

<bundles_post_ra>
// kernel: tpu_custom_call.1
= control target key start
LH: loop header
LB: loop body
LE: loop exit
PB: predicated region body
PF: predicated region fallthrough
CT: control target
= control target key end

     0   :  { %12 = vsyncpa [#allocation3], 0  ;;  %s615_s0 = inlined_call_operand.hbm [shape: f32[6,128], index: 0, kind: input, shape index: {}]   ;;  %s616_s1 = inlined_call_operand.hbm [shape: f32[1,128], index: 1, kind: input, shape index: {}]   ;;  %s617_s2 = inlined_call_operand.hbm [shape: f32[128,128], index: 2, kind: input, shape index: {}]   ;;  %s618_s3 = inlined_call_operand.hbm [shape: f32[128,128], index: 3, kind: input, shape index: {}]   ;;  %s619_s4 = inlined_call_operand.vmem [shape: f32[1,128], index: 4, kind: input, shape index: {}]   ;;  %s620_s5 = inlined_call_operand.hbm [shape: f32[1,128], index: 5, kind: output, shape index: {0}]   ;;  %s621_s6 = inlined_call_operand.hbm [shape: f32[1,128], index: 6, kind: output, shape index: {1}]  }
   0x1   :  { %13 = vsyncpa [#allocation6], 0 }
   0x2   :  { %14 = vsyncpa [#allocation9], 0 }
   0x3   :  { %15 = vsyncpa [#allocation4], 0  ;;  %s33_s23 = sshll.u32 %s616_s1, 4  ;;  %s34_s23 = int_to_ptr.hbm [resolvable:$true] %s33_s23 }
   0x4   :  { %16 = vsyncpa [#allocation12], 0  ;;  %s479_s24 = smov [#allocation5]   ;;  %s22_s28 = sshll.u32 %s615_s0, 4  ;;  %s23_s28 = int_to_ptr.hbm [resolvable:$true] %s22_s28 }
   0x5   :  { %s35_s25 = sshll.u32 %s479_s24, 4  ;;  %s480_s29 = smov [#allocation2]   ;;  %s36_s25 = int_to_ptr.vmem [resolvable:$true] %s35_s25 }
   0x6   :  { %38 = dma.hbm_to_vmem [thread:$0]  %s34_s23, 16, %s36_s25, [#allocation6]  }
   0x7   :  { %s24_s30 = sshll.u32 %s480_s29, 4  ;;  %s43_s9 = sshll.u32 %s617_s2, 4  ;;  %s25_s30 = int_to_ptr.vmem [resolvable:$true] %s24_s30  ;;  %s44_s9 = int_to_ptr.hbm [resolvable:$true] %s43_s9 }
   0x8   :  { %27 = dma.hbm_to_vmem [thread:$0]  %s23_s28, 128, %s25_s30, [#allocation3]  }
   0x9   :  { %s481_s1 = smov [#allocation7]   ;;  %s56_s13 = sshll.u32 %s618_s3, 4  ;;  %s57_s13 = int_to_ptr.hbm [resolvable:$true] %s56_s13 }
   0xa   :  { %s45_s10 = sshll.u32 %s481_s1, 4  ;;  %s482_s14 = smov 128   ;;  %s46_s10 = int_to_ptr.vmem [resolvable:$true] %s45_s10 }
   0xb   :  { %s483_s0 = smov 8   ;;  %s484_s15 = smov [#allocation8]  }
   0xc   :  { %51 = dma.hbm_to_vmem [thread:$0]  %s44_s9, 2048, %s46_s10, [#allocation6], %s482_s14, %s482_s14, %s483_s0  }
   0xd   :  { %s58_s16 = sshll.u32 %s484_s15, 4  ;;  %s59_s16 = int_to_ptr.vmem [resolvable:$true] %s58_s16 }
   0xe   :  { %64 = dma.hbm_to_vmem [thread:$0]  %s57_s13, 2048, %s59_s16, [#allocation9], %s482_s14, %s482_s14, %s483_s0  }
   0xf   :  { %469 = dma.done.wait [#allocation3], 128  }
  0x10   :  { %470 = vsyncadd [#allocation3], 4294967168 }
  0x11   :  { %471 = dma.done.wait [#allocation6], 2064  }
  0x12   :  { %472 = vsyncadd [#allocation6], 4294965232 }
  0x13   :  { %473 = dma.done.wait [#allocation9], 2048  }
  0x14   :  { %474 = vsyncadd [#allocation9], 4294965248  ;;  %v534_v0 = vld [vmem:[#allocation7 + $0x78] sm:$0xff]  ;;  %v536_v1 = vld [vmem:[#allocation7 + $0x70] sm:$0xff]  ;;  %vm264_vm0 = vcmask 1040384   ;;  %s296_s20 = sshll.u32 %s621_s6, 4  ;;  %s297_s20 = int_to_ptr.hbm [resolvable:$true] %s296_s20 }
  0x15   :  { %101 = vmatpush.msra.mxu0 %v534_v0  ;;  %122 = vmatpush.msra.mxu1 %v534_v0  ;;  %v540_v2 = vld [vmem:[#allocation7 + $0x68] sm:$0xff]  ;;  %v546_v3 = vld [vmem:[#allocation7 + $0x60] sm:$0xff]  ;;  %v552_v4 = vld [vmem:[#allocation7 + $0x58] sm:$0xff]  ;;  %s486_s21 = smov [#allocation10]   ;;  %s285_s25 = sshll.u32 %s620_s5, 4  ;;  %s286_s25 = int_to_ptr.hbm [resolvable:$true] %s285_s25 }
  0x16   :  { %143 = vmatpush.msra.mxu2 %v534_v0  ;;  %164 = vmatpush.msra.mxu3 %v534_v0  ;;  %v558_v5 = vld [vmem:[#allocation7 + $0x50] sm:$0xff]  ;;  %v564_v6 = vld [vmem:[#allocation7 + $0x48] sm:$0xff]  ;;  %v570_v7 = vld [vmem:[#allocation7 + $0x40] sm:$0xff]  ;;  %s283_s22 = sshll.u32 %s486_s21, 4  ;;  %s284_s22 = int_to_ptr.vmem [resolvable:$true] %s283_s22 }
  0x17   :  { %102 = vmatpush.msra.mxu0 %v536_v1  ;;  %123 = vmatpush.msra.mxu1 %v536_v1  ;;  %v576_v8 = vld [vmem:[#allocation7 + $0x38] sm:$0xff]  ;;  %v89_v9 = vld [vmem:[#allocation7 + $0x30] sm:$0xff]  ;;  %v88_v10 = vld [vmem:[#allocation7 + $0x28] sm:$0xff] }
  0x18   :  { %144 = vmatpush.msra.mxu2 %v536_v1  ;;  %165 = vmatpush.msra.mxu3 %v536_v1  ;;  %v87_v11 = vld [vmem:[#allocation7 + $0x20] sm:$0xff]  ;;  %v86_v12 = vld [vmem:[#allocation7 + $0x18] sm:$0xff]  ;;  %v85_v13 = vld [vmem:[#allocation7 + $0x10] sm:$0xff] }
  0x19   :  { %103 = vmatpush.msra.mxu0 %v540_v2  ;;  %124 = vmatpush.msra.mxu1 %v540_v2  ;;  %v84_v14 = vld [vmem:[#allocation7 + $0x8] sm:$0xff]  ;;  %v83_v15 = vld [vmem:[#allocation7] sm:$0xff]  ;;  %v99_v16 = vld [vmem:[%s619_s4] sm:$0x1]  ;;  %s485_s4 = smov [#allocation11]  }
  0x1a   :  { %145 = vmatpush.msra.mxu2 %v540_v2  ;;  %166 = vmatpush.msra.mxu3 %v540_v2  ;;  %v100_v17 = vld [vmem:[#allocation2] sm:$0x1]  ;;  %v121_v20 = vld [vmem:[#allocation2 + $0x1] sm:$0x1]  ;;  %v142_v23 = vld [vmem:[#allocation2 + $0x2] sm:$0x1] }
  0x1b   :  { %104 = vmatpush.msra.mxu0 %v546_v3  ;;  %125 = vmatpush.msra.mxu1 %v546_v3  ;;  %v242_v26 = vld [vmem:[#allocation8 + $0x78] sm:$0xff]  ;;  %v241_v27 = vld [vmem:[#allocation8 + $0x70] sm:$0xff]  ;;  %v240_v28 = vld [vmem:[#allocation8 + $0x68] sm:$0xff]  ;;  %s294_s17 = sshll.u32 %s485_s4, 4  ;;  %s295_s17 = int_to_ptr.vmem [resolvable:$true] %s294_s17 }
  0x1c   :  { %146 = vmatpush.msra.mxu2 %v546_v3  ;;  %167 = vmatpush.msra.mxu3 %v546_v3  ;;  %v239_v29 = vld [vmem:[#allocation8 + $0x60] sm:$0xff]  ;;  %v238_v30 = vld [vmem:[#allocation8 + $0x58] sm:$0xff]  ;;  %v237_v31 = vld [vmem:[#allocation8 + $0x50] sm:$0xff] }
  0x1d   :  { %105 = vmatpush.msra.mxu0 %v552_v4  ;;  %126 = vmatpush.msra.mxu1 %v552_v4  ;;  %v236_v32 = vld [vmem:[#allocation8 + $0x48] sm:$0xff]  ;;  %v235_v33 = vld [vmem:[#allocation8 + $0x40] sm:$0xff]  ;;  %v234_v34 = vld [vmem:[#allocation8 + $0x38] sm:$0xff] }
  0x1e   :  { %147 = vmatpush.msra.mxu2 %v552_v4  ;;  %168 = vmatpush.msra.mxu3 %v552_v4  ;;  %v233_v35 = vld [vmem:[#allocation8 + $0x30] sm:$0xff]  ;;  %v232_v36 = vld [vmem:[#allocation8 + $0x28] sm:$0xff]  ;;  %v231_v37 = vld [vmem:[#allocation8 + $0x20] sm:$0xff] }
  0x1f   :  { %106 = vmatpush.msra.mxu0 %v558_v5  ;;  %127 = vmatpush.msra.mxu1 %v558_v5  ;;  %v230_v38 = vld [vmem:[#allocation8 + $0x18] sm:$0xff]  ;;  %v229_v39 = vld [vmem:[#allocation8 + $0x10] sm:$0xff]  ;;  %v228_v43 = vld [vmem:[#allocation8 + $0x8] sm:$0xff] }
  0x20   :  { %148 = vmatpush.msra.mxu2 %v558_v5  ;;  %169 = vmatpush.msra.mxu3 %v558_v5  ;;  %v163_v40 = vld [vmem:[#allocation2 + $0x3] sm:$0x1]  ;;  %v227_v44 = vld [vmem:[#allocation8] sm:$0xff]  ;;  %v184_v45 = vld [vmem:[#allocation2 + $0x4] sm:$0x1] }
  0x21   :  { %107 = vmatpush.msra.mxu0 %v564_v6  ;;  %128 = vmatpush.msra.mxu1 %v564_v6  ;;  %v205_v48 = vld [vmem:[#allocation2 + $0x5] sm:$0x1]  ;;  %v243_v51 = vld [vmem:[#allocation5] sm:$0x1] }
  0x22   :  { %149 = vmatpush.msra.mxu2 %v564_v6  ;;  %170 = vmatpush.msra.mxu3 %v564_v6 }
  0x23   :  { %108 = vmatpush.msra.mxu0 %v570_v7  ;;  %129 = vmatpush.msra.mxu1 %v570_v7 }
  0x24   :  { %150 = vmatpush.msra.mxu2 %v570_v7  ;;  %171 = vmatpush.msra.mxu3 %v570_v7 }
  0x25   :  { %109 = vmatpush.msra.mxu0 %v576_v8  ;;  %130 = vmatpush.msra.mxu1 %v576_v8 }
  0x26   :  { %151 = vmatpush.msra.mxu2 %v576_v8  ;;  %172 = vmatpush.msra.mxu3 %v576_v8 }
  0x27   :  { %110 = vmatpush.msra.mxu0 %v89_v9  ;;  %131 = vmatpush.msra.mxu1 %v89_v9 }
  0x28   :  { %152 = vmatpush.msra.mxu2 %v89_v9  ;;  %173 = vmatpush.msra.mxu3 %v89_v9 }
  0x29   :  { %111 = vmatpush.msra.mxu0 %v88_v10  ;;  %132 = vmatpush.msra.mxu1 %v88_v10 }
  0x2a   :  { %153 = vmatpush.msra.mxu2 %v88_v10  ;;  %174 = vmatpush.msra.mxu3 %v88_v10 }
  0x2b   :  { %112 = vmatpush.msra.mxu0 %v87_v11  ;;  %133 = vmatpush.msra.mxu1 %v87_v11 }
  0x2c   :  { %154 = vmatpush.msra.mxu2 %v87_v11  ;;  %175 = vmatpush.msra.mxu3 %v87_v11 }
  0x2d   :  { %113 = vmatpush.msra.mxu0 %v86_v12  ;;  %134 = vmatpush.msra.mxu1 %v86_v12 }
  0x2e   :  { %155 = vmatpush.msra.mxu2 %v86_v12  ;;  %176 = vmatpush.msra.mxu3 %v86_v12 }
  0x2f   :  { %114 = vmatpush.msra.mxu0 %v85_v13  ;;  %135 = vmatpush.msra.mxu1 %v85_v13 }
  0x30   :  { %156 = vmatpush.msra.mxu2 %v85_v13  ;;  %177 = vmatpush.msra.mxu3 %v85_v13 }
  0x31   :  { %115 = vmatpush.msra.mxu0 %v84_v14  ;;  %136 = vmatpush.msra.mxu1 %v84_v14 }
  0x32   :  { %157 = vmatpush.msra.mxu2 %v84_v14  ;;  %178 = vmatpush.msra.mxu3 %v84_v14 }
  0x33   :  { %116 = vmatpush.msra.mxu0 %v83_v15  ;;  %137 = vmatpush.msra.mxu1 %v83_v15 }
  0x34   :  { %117 = vmatmul.f32.vlgmr.msra.gmra.mxu0 %v99_v16  ;;  %158 = vmatpush.msra.mxu2 %v83_v15 }
  0x35   :  { %179 = vmatpush.msra.mxu3 %v83_v15  ;;  %185 = vmatpush.msrb.mxu0 %v534_v0 }
  0x36   :  { %206 = vmatpush.msrb.mxu1 %v534_v0  ;;  %244 = vmatpush.msrb.mxu2 %v242_v26 }
  0x37   :  { %186 = vmatpush.msrb.mxu0 %v536_v1 }
  0x38   :  { %207 = vmatpush.msrb.mxu1 %v536_v1  ;;  %245 = vmatpush.msrb.mxu2 %v241_v27 }
  0x39   :  { %187 = vmatpush.msrb.mxu0 %v540_v2 }
  0x3a   :  { %208 = vmatpush.msrb.mxu1 %v540_v2  ;;  %246 = vmatpush.msrb.mxu2 %v240_v28 }
  0x3b   :  { %188 = vmatpush.msrb.mxu0 %v546_v3 }
  0x3c   :  { %209 = vmatpush.msrb.mxu1 %v546_v3  ;;  %247 = vmatpush.msrb.mxu2 %v239_v29 }
  0x3d   :  { %189 = vmatpush.msrb.mxu0 %v552_v4 }
  0x3e   :  { %210 = vmatpush.msrb.mxu1 %v552_v4  ;;  %248 = vmatpush.msrb.mxu2 %v238_v30 }
  0x3f   :  { %190 = vmatpush.msrb.mxu0 %v558_v5 }
  0x40   :  { %211 = vmatpush.msrb.mxu1 %v558_v5  ;;  %249 = vmatpush.msrb.mxu2 %v237_v31 }
  0x41   :  { %191 = vmatpush.msrb.mxu0 %v564_v6 }
  0x42   :  { %212 = vmatpush.msrb.mxu1 %v564_v6  ;;  %250 = vmatpush.msrb.mxu2 %v236_v32 }
  0x43   :  { %192 = vmatpush.msrb.mxu0 %v570_v7 }
  0x44   :  { %213 = vmatpush.msrb.mxu1 %v570_v7  ;;  %251 = vmatpush.msrb.mxu2 %v235_v33 }
  0x45   :  { %193 = vmatpush.msrb.mxu0 %v576_v8 }
  0x46   :  { %214 = vmatpush.msrb.mxu1 %v576_v8  ;;  %252 = vmatpush.msrb.mxu2 %v234_v34 }
  0x47   :  { %194 = vmatpush.msrb.mxu0 %v89_v9 }
  0x48   :  { %215 = vmatpush.msrb.mxu1 %v89_v9  ;;  %253 = vmatpush.msrb.mxu2 %v233_v35 }
  0x49   :  { %195 = vmatpush.msrb.mxu0 %v88_v10 }
  0x4a   :  { %216 = vmatpush.msrb.mxu1 %v88_v10  ;;  %254 = vmatpush.msrb.mxu2 %v232_v36 }
  0x4b   :  { %196 = vmatpush.msrb.mxu0 %v87_v11 }
  0x4c   :  { %217 = vmatpush.msrb.mxu1 %v87_v11  ;;  %255 = vmatpush.msrb.mxu2 %v231_v37 }
  0x4d   :  { %197 = vmatpush.msrb.mxu0 %v86_v12 }
  0x4e   :  { %218 = vmatpush.msrb.mxu1 %v86_v12  ;;  %256 = vmatpush.msrb.mxu2 %v230_v38 }
  0x4f   :  { %198 = vmatpush.msrb.mxu0 %v85_v13 }
  0x50   :  { %219 = vmatpush.msrb.mxu1 %v85_v13  ;;  %257 = vmatpush.msrb.mxu2 %v229_v39 }
  0x51   :  { %199 = vmatpush.msrb.mxu0 %v84_v14 }
  0x52   :  { %220 = vmatpush.msrb.mxu1 %v84_v14  ;;  %258 = vmatpush.msrb.mxu2 %v228_v43 }
  0x53   :  { %200 = vmatpush.msrb.mxu0 %v83_v15 }
  0x54   :  { %221 = vmatpush.msrb.mxu1 %v83_v15  ;;  %259 = vmatpush.msrb.mxu2 %v227_v44 }
  0xb1   :  { %v118_v18 = vpop.f32.mrf.mxu0 }
  0xb2   :  { %v119_v19 = vadd.f32 %v118_v18, %v100_v17 }
  0xb4   :  { %138 = vmatmul.f32.vlgmr.msra.gmra.mxu1 %v119_v19 }
 0x131   :  { %v139_v21 = vpop.f32.mrf.mxu1 }
 0x132   :  { %v140_v22 = vadd.f32 %v139_v21, %v121_v20 }
 0x134   :  { %159 = vmatmul.f32.vlgmr.msra.gmra.mxu2 %v140_v22 }
 0x1b7   :  { %v160_v24 = vpop.f32.mrf.mxu2 }
 0x1b8   :  { %v161_v25 = vadd.f32 %v160_v24, %v142_v23 }
 0x1ba   :  { %180 = vmatmul.f32.vlgmr.msra.gmra.mxu3 %v161_v25 }
 0x23d   :  { %v181_v41 = vpop.f32.mrf.mxu3 }
 0x23e   :  { %v182_v42 = vadd.f32 %v181_v41, %v163_v40 }
 0x240   :  { %201 = vmatmul.f32.vlgmr.msrb.gmra.mxu0 %v182_v42 }
 0x2bd   :  { %v202_v46 = vpop.f32.mrf.mxu0 }
 0x2be   :  { %v203_v47 = vadd.f32 %v202_v46, %v184_v45 }
 0x2c0   :  { %222 = vmatmul.f32.vlgmr.msrb.gmra.mxu1 %v203_v47  ;;  %260 = vmatmul.f32.vlgmr.msrb.gmra.mxu2 %v203_v47 }
 0x33d   :  { %v223_v49 = vpop.f32.mrf.mxu1 }
 0x33e   :  { %v224_v50 = vadd.f32 %v223_v49, %v205_v48 }
 0x340   :  { %226 = vst [vmem:[#allocation11] sm:$0x1] %v224_v50 }
 0x341   :  { %299 = dma.vmem_to_hbm [thread:$0]  %s295_s17, 16, %s297_s20, [#allocation12]  }
 0x343   :  { %v261_v52 = vpop.f32.mrf.mxu2 }
 0x344   :  { %v262_v53 = vadd.f32 %v261_v52, %v243_v51 }
 0x346   :  { %v265_v54 = vsel %vm264_vm0, %v262_v53, -inf }
 0x347   :  { %266 = vmax.xlane.f32.xlu0 %v265_v54 }
 0x3ba   :  { %v267_v55 = vpop.xlane.xlu0 %266 }
 0x3bb   :  { %v268_v56 = vsub.f32 %v262_v53, %v267_v55 }
 0x3bd   :  { %v269_v57 = vmul.f32 1.442695, %v268_v56 }
 0x3bf   :  { %321 = vpow2.f32 %v269_v57 }
 0x3c5   :  { %v322_v58 = vpop.eup %321 }
 0x3c6   :  { %v271_v59 = vsel %vm264_vm0, %v322_v58, 0.0 }
 0x3c7   :  { %272 = vadd.xlane.f32.xlu0 %v271_v59 }
 0x43a   :  { %v273_v60 = vpop.xlane.xlu0 %272 }
 0x43b   :  { %323 = vlog2.f32 %v273_v60 }
 0x441   :  { %v324_v61 = vpop.eup %323 }
 0x442   :  { %v275_v62 = vmul.f32 0.6931472, %v324_v61 }
 0x444   :  { %v276_v63 = vsub.f32 %v268_v56, %v275_v62 }
 0x446   :  { %277 = vst [vmem:[#allocation10] sm:$0x1] %v276_v63 }
 0x447   :  { %288 = dma.vmem_to_hbm [thread:$0]  %s284_s22, 16, %s286_s25, [#allocation4]  }
 0x448   :  { %475 = dma.done.wait [#allocation4], 16  }
 0x449   :  { %476 = vsyncadd [#allocation4], 4294967280 }
 0x44a   :  { %477 = dma.done.wait [#allocation12], 16  }
 0x44b   :  { %478 = vsyncadd [#allocation12], 4294967280 }
 0x44c   :  { %308 = vsyncpa [#allocation3], 1 }
 0x44d   :  { %309 = vsyncpa [#allocation6], 1 }
 0x44e   :  { %310 = vsyncpa [#allocation9], 1 }
 0x44f   :  { %311 = vsyncpa [#allocation4], 1 }
 0x450   :  { %312 = vsyncpa [#allocation12], 1 }

</bundles_post_ra>
